<compile_context>
chip_gen: v6e
topology: v6e:2x2x1
jax: 0.10.0
libtpu: 0.0.40
codegen_flags: <defaults>
</compile_context>

<pallas_src>
import random
import numpy as np
import jax
import jax.numpy as jnp
from jax.experimental import pallas as pl
from jax.experimental.pallas import tpu as pltpu

BN_EPS = 1e-5


def _bn_train(x, gamma, beta):
    # PyTorch BatchNorm2d training-mode forward with N=1: stats over H*W, biased variance.
    mean = jnp.mean(x, axis=1, keepdims=True)
    xc = x - mean
    var = jnp.mean(xc * xc, axis=1, keepdims=True)
    return xc * jax.lax.rsqrt(var + BN_EPS) * gamma + beta


def _detect_roll_direction():
    """Return +1 if pltpu.roll follows np.roll semantics (out[i] = in[i - shift]),
    -1 if it rotates the other way.  Makes the static im2col shift sign robust."""
    def probe(x_ref, o_ref):
        o_ref[...] = pltpu.roll(x_ref[...], 1, axis=1)

    x = jnp.broadcast_to(jnp.arange(128, dtype=jnp.float32)[None, :], (8, 128))
    y = pl.pallas_call(
        probe,
        out_shape=jax.ShapeDtypeStruct((8, 128), jnp.float32),
        in_specs=[pl.BlockSpec(memory_space=pltpu.MemorySpace.VMEM)],
        out_specs=pl.BlockSpec(memory_space=pltpu.MemorySpace.VMEM),
    )(x)
    return 1 if float(y[0, 1]) == 0.0 else -1


def make_fused_kernel(block_kd, H, W, width, scale, c_pad, roll_dir):
    """Kernel body for the whole 4-block Res2Net forward (K/D choices are static)."""
    HW = H * W
    ws = width * scale
    nums = scale - 1
    n_blocks = len(block_kd)
    PPB = 3 + nums                  # params per block: dense1, taps*nums, dense3, bnpack
    # dilations that actually need wrap-validity masks (K > 1)
    need_d = sorted({d for (Ks, Ds) in block_kd for k, d in zip(Ks, Ds) if k > 1})

    def kernel(*refs):
        npar = n_blocks * PPB
        x_ref = refs[0]
        o_ref = refs[1 + npar]
        stk_ref = refs[2 + npar]    # (9*width, HW) stacked rolled+masked tap inputs
        t_ref = refs[3 + npar]      # (scale*width, HW) staged post-conv1/bn1/relu tensor

        # Combined (dy,dx) validity masks per dilation, built once from an in-kernel iota
        # and hoisted out of every loop.  Row validity needs no division: h >= d  <=>
        # flat >= d*W  and  h < H-d  <=>  flat < (H-d)*W.
        comb = {}
        if need_d:
            iota = jax.lax.broadcasted_iota(jnp.int32, (1, HW), 1)
            if (W & (W - 1)) == 0:
                w_idx = jnp.bitwise_and(iota, W - 1)      # fast path: W power of two
            else:
                w_idx = jax.lax.rem(iota, W)
            for d in need_d:
                row = {-1: iota >= d * W, 0: None, 1: iota < (H - d) * W}
                col = {-1: w_idx >= d, 0: None, 1: w_idx < W - d}
                md = {}
                for sy in (-1, 0, 1):
                    for sx in (-1, 0, 1):
                        if sy == 0 and sx == 0:
                            md[(sy, sx)] = None
                            continue
                        m = row[sy]
                        if col[sx] is not None:
                            m = col[sx] if m is None else jnp.logical_and(m, col[sx])
                        md[(sy, sx)] = m.astype(jnp.float32)
                comb[d] = md

        z = x_ref[...]                                           # (c_pad, HW)

        for b in range(n_blocks):
            base = 1 + b * PPB
            d1_ref = refs[base]                                  # (width*scale, c_pad)
            d3_ref = refs[base + 1 + nums]                       # (scale, c_pad, width)
            bnp_ref = refs[base + 2 + nums]                      # (ws + nums*width + c_pad, 2)
            Ks, Ds = block_kd[b]

            # conv1 (grouped 1x1 -> dense matmul, rows already in (scale, group, hidden) order)
            t = jnp.dot(d1_ref[...], z, preferred_element_type=jnp.float32)
            t = jnp.maximum(_bn_train(t, bnp_ref[0:ws, 0:1], bnp_ref[0:ws, 1:2]), 0.0)
            # t is 80 vregs (> the 64-vreg file): stage it once explicitly instead of letting
            # the register allocator spill it piecemeal inside the fully-unrolled tap loops.
            t_ref[...] = t

            # conv3 partial for the untouched tail branch spx[scale-1]
            y3 = jnp.dot(d3_ref[nums], t_ref[nums * width:ws, :],
                         preferred_element_type=jnp.float32)

            sp = None
            for i in range(nums):
                add = t_ref[i * width:(i + 1) * width, :]
                sp = add if i == 0 else sp + add
                K, D = Ks[i], Ds[i]
                taps = refs[base + 1 + i][...]                   # (width, K*K*width)

                if K == 1:
                    y = jnp.dot(taps, sp, preferred_element_type=jnp.float32)
                else:
                    # grouped KxK dilated "same" conv: lane-aligned roll (XLU slot) + combined
                    # validity mask per tap, stacked along the contraction axis into VMEM,
                    # then ONE deep MXU matmul.
                    half = (K - 1) // 2
                    md = comb[D]
                    for ky in range(K):
                        dy = (ky - half) * D
                        for kx in range(K):
                            dx = (kx - half) * D
                            shift = (-roll_dir * (dy * W + dx)) % HW
                            xs = pltpu.roll(sp, shift, axis=1) if shift else sp
                            m = md[(ky - half, kx - half)]
                            if m is not None:
                                xs = xs * m
                            tap = ky * K + kx
                            stk_ref[tap * width:(tap + 1) * width, :] = xs
                    # K is always 1 or 3, so K == 3 uses the whole (9*width, HW) scratch.
                    y = jnp.dot(taps, stk_ref[...], preferred_element_type=jnp.float32)

                # NOTE: the conv bias is intentionally dropped — a per-channel constant added
                # before training-mode BN cancels exactly in the batch statistics.
                off = ws + i * width
                sp = jnp.maximum(_bn_train(y, bnp_ref[off:off + width, 0:1],
                                           bnp_ref[off:off + width, 1:2]), 0.0)
                # conv3 (grouped 1x1) accumulated per branch: no (scale*width, HW) cat buffer.
                y3 = y3 + jnp.dot(d3_ref[i], sp, preferred_element_type=jnp.float32)

            # bn3 (the Res2Net residual epsilon is folded into gamma/beta at param-prep time)
            off = ws + nums * width
            z = _bn_train(y3, bnp_ref[off:off + c_pad, 0:1],
                          bnp_ref[off:off + c_pad, 1:2]) + z

        o_ref[...] = z

    return kernel


def make_fused_call(block_kd, H, W, width, scale, c_pad, roll_dir):
    HW = H * W
    nums = scale - 1
    PPB = 3 + nums
    n_in = 1 + len(block_kd) * PPB
    kernel = make_fused_kernel(block_kd, H, W, width, scale, c_pad, roll_dir)
    return pl.pallas_call(
        kernel,
        out_shape=jax.ShapeDtypeStruct((c_pad, HW), jnp.float32),
        in_specs=[pl.BlockSpec(memory_space=pltpu.MemorySpace.VMEM)] * n_in,
        out_specs=pl.BlockSpec(memory_space=pltpu.MemorySpace.VMEM),
        scratch_shapes=[
            pltpu.VMEM((9 * width, HW), jnp.float32),      # stacked rolled+masked tap inputs
            pltpu.VMEM((scale * width, HW), jnp.float32),  # staged post-conv1/bn1/relu tensor
        ],
    )


def init_block_params(key, Ks, inplanes, planes, hidden, scale, batch, c_pad, eps_res):
    """Deterministic synthetic parameters, pre-processed into dense kernel-ready form.
    Also returns the raw (torch-layout) parameters for the pure-JAX reference."""
    width = hidden * batch
    nums = scale - 1
    ws = width * scale
    keys = iter(jax.random.split(key, 8 + 4 * nums))

    def nrm(shape, s=0.1):
        return np.asarray(s * jax.random.normal(next(keys), shape, dtype=jnp.float32))

    raw = {"wc": [], "biasc": [], "gc": [], "bc": []}

    # ---- conv1: grouped (width*scale, inplanes, 1, 1), groups=batch, no bias + bn1 ----
    w1_raw = nrm((ws, inplanes))
    g1 = np.asarray(1.0 + 0.1 * jax.random.normal(next(keys), (ws,), dtype=jnp.float32))
    b1 = nrm((ws,))
    raw["w1"] = w1_raw.reshape(ws, inplanes, 1, 1)
    raw["g1"], raw["b1"] = g1, b1

    coutpg1 = scale * hidden
    dense1 = np.zeros((ws, c_pad), np.float32)                   # pad column(s) stay zero
    for g in range(batch):
        dense1[g * coutpg1:(g + 1) * coutpg1, g * inplanes:(g + 1) * inplanes] = \
            w1_raw[g * coutpg1:(g + 1) * coutpg1]
    # fold the view/transpose permutation: (group, scale, hidden) -> (scale, group, hidden)
    dense1 = dense1.reshape(batch, scale, hidden, c_pad).transpose(1, 0, 2, 3).reshape(ws, c_pad)
    perm = lambda v: v.reshape(batch, scale, hidden).transpose(1, 0, 2).reshape(-1)
    bn1 = np.stack([perm(g1), perm(b1)], axis=1)                 # (ws, 2)

    # ---- branch convs: grouped KxK, dilated, bias=True (bias cancels in training BN) ----
    taps_list = []
    cbn_rows = []
    for i in range(nums):
        K = Ks[i]
        wraw = nrm((width, hidden, K, K))
        bias = nrm((width,))
        gc = np.asarray(1.0 + 0.1 * jax.random.normal(next(keys), (width,), dtype=jnp.float32))
        bc = nrm((width,))
        raw["wc"].append(wraw)
        raw["biasc"].append(bias)
        raw["gc"].append(gc)
        raw["bc"].append(bc)
        taps = np.zeros((K * K, width, width), np.float32)
        for ky in range(K):
            for kx in range(K):
                for g in range(batch):
                    taps[ky * K + kx,
                         g * hidden:(g + 1) * hidden,
                         g * hidden:(g + 1) * hidden] = wraw[g * hidden:(g + 1) * hidden, :, ky, kx]
        # reshape taps for the single stacked-contraction matmul: (width, K*K*width)
        taps_list.append(taps.transpose(1, 0, 2).reshape(width, K * K * width))
        # conv bias is NOT packed: it cancels exactly under training-mode BN
        cbn_rows.append(np.stack([gc, bc], axis=1))              # (width, 2)

    # ---- conv3: grouped (planes*batch, scale*hidden, 1, 1), groups=batch, no bias + bn3 ----
    cinpg3 = scale * hidden
    w3_raw = nrm((planes * batch, cinpg3))
    g3 = np.asarray(1.0 + 0.1 * jax.random.normal(next(keys), (planes * batch,), dtype=jnp.float32))
    b3 = nrm((planes * batch,))
    raw["w3"] = w3_raw.reshape(planes * batch, cinpg3, 1, 1)
    raw["g3"], raw["b3"] = g3, b3

    dense3 = np.zeros((planes * batch, ws), np.float32)
    for g in range(batch):
        dense3[g * planes:(g + 1) * planes, g * cinpg3:(g + 1) * cinpg3] = \
            w3_raw[g * planes:(g + 1) * planes]
    # fold the inverse permutation into the columns: input arrives in (scale, group, hidden) order
    dense3 = dense3.reshape(planes * batch, batch, scale, hidden).transpose(0, 2, 1, 3) \
                   .reshape(planes * batch, ws)
    dense3_pad = np.zeros((c_pad, ws), np.float32)               # pad row stays zero
    dense3_pad[:planes * batch] = dense3
    # split per scale-branch for the per-branch conv3 accumulation: (scale, c_pad, width)
    dense3_split = np.ascontiguousarray(dense3_pad.reshape(c_pad, scale, width).transpose(1, 0, 2))

    # bn3 with the residual epsilon folded in: y3*eps + x == (eps*g)*xhat + (eps*b) + x
    bn3 = np.zeros((c_pad, 2), np.float32)
    bn3[:planes * batch, 0] = eps_res * g3
    bn3[:planes * batch, 1] = eps_res * b3                       # pad rows 0 -> pad channel stays 0

    bnpack = np.concatenate([bn1] + cbn_rows + [bn3], axis=0)    # (ws + nums*width + c_pad, 2)

    params = [jnp.asarray(dense1)] + [jnp.asarray(t) for t in taps_list] + \
             [jnp.asarray(dense3_split), jnp.asarray(bnpack)]
    return params, raw


# ----------------------------- pure-JAX reference (for checking) -----------------------------

def _bn_train_nchw(x, gamma, beta):
    mean = jnp.mean(x, axis=(0, 2, 3), keepdims=True)
    xc = x - mean
    var = jnp.mean(xc * xc, axis=(0, 2, 3), keepdims=True)
    return xc * jax.lax.rsqrt(var + BN_EPS) * gamma[None, :, None, None] + beta[None, :, None, None]


def res2net_reference(x, raws, block_kd, hidden, scale, batch, eps):
    """Pure-JAX re-implementation of the PyTorch module (training-mode BN)."""
    dn = ("NCHW", "OIHW", "NCHW")
    hp = jax.lax.Precision.HIGHEST
    width = hidden * batch
    nums = scale - 1
    _, _, H, W = x.shape
    z = x
    for raw, (Ks, Ds) in zip(raws, block_kd):
        out = jax.lax.conv_general_dilated(z, jnp.asarray(raw["w1"]), (1, 1), [(0, 0), (0, 0)],
                                           dimension_numbers=dn, feature_group_count=batch,
                                           precision=hp)
        out = jax.nn.relu(_bn_train_nchw(out, jnp.asarray(raw["g1"]), jnp.asarray(raw["b1"])))
        out = jnp.swapaxes(out.reshape(1, batch, scale, hidden, H, W), 1, 2)
        out = out.reshape(1, scale * width, H, W)
        spx = [out[:, s * width:(s + 1) * width] for s in range(scale)]
        branches = []
        sp = None
        for i in range(nums):
            sp = spx[i] if i == 0 else sp + spx[i]
            K, D = Ks[i], Ds[i]
            P = (K - 1) // 2 * D
            y = jax.lax.conv_general_dilated(sp, jnp.asarray(raw["wc"][i]), (1, 1),
                                             [(P, P), (P, P)], rhs_dilation=(D, D),
                                             dimension_numbers=dn, feature_group_count=batch,
                                             precision=hp)
            y = y + jnp.asarray(raw["biasc"][i])[None, :, None, None]
            sp = jax.nn.relu(_bn_train_nchw(y, jnp.asarray(raw["gc"][i]), jnp.asarray(raw["bc"][i])))
            branches.append(sp)
        branches.append(spx[nums])
        cat = jnp.concatenate(branches, axis=1)
        cat = jnp.swapaxes(cat.reshape(1, scale, batch, hidden, H, W), 1, 2)
        cat = cat.reshape(1, batch * scale * hidden, H, W)
        y3 = jax.lax.conv_general_dilated(cat, jnp.asarray(raw["w3"]), (1, 1), [(0, 0), (0, 0)],
                                          dimension_numbers=dn, feature_group_count=batch,
                                          precision=hp)
        y3 = _bn_train_nchw(y3, jnp.asarray(raw["g3"]), jnp.asarray(raw["b3"]))
        z = y3 * eps + z
    return z


# --------------------------------------- wrapper ---------------------------------------------

class Res2NetPallas:
    def __init__(self, epsilon=0.2, hidden_planes=16, batch_size=5, H=16, W=16, seed=0):
        self.epsilon = float(epsilon)
        self.H, self.W = H, W
        self.scale = 4
        self.hidden = hidden_planes
        self.batch = batch_size
        self.c_in = 3 * batch_size
        # pad channels to a multiple of 8 sublanes (15 -> 16); pad channel stays exactly zero
        self.c_pad = ((self.c_in + 7) // 8) * 8
        width = hidden_planes * batch_size

        random.seed(seed)   # deterministic replacement for the module's random.choice K/D draws
        key = jax.random.PRNGKey(0)
        block_kd, params, raws = [], [], []
        for _ in range(4):
            Ks, Ds = [], []
            for _ in range(self.scale - 1):
                Ks.append(random.choice([1, 3]))
                Ds.append(random.choice([1, 2, 3]))
            block_kd.append((tuple(Ks), tuple(Ds)))
            key, sub = jax.random.split(key)
            p, raw = init_block_params(sub, Ks, 3, 3, hidden_planes, self.scale,
                                       batch_size, self.c_pad, self.epsilon)
            params += p
            raws.append(raw)
        self.params = params
        self.raws = raws
        self.block_kd = block_kd
        roll_dir = _detect_roll_direction()
        self.call = make_fused_call(block_kd, H, W, width, self.scale, self.c_pad, roll_dir)

    def __call__(self, x):
        # x: NCHW with N == 1 (the torch module's views require N == 1)
        n, c, h, w = x.shape
        assert n == 1 and c == self.c_in and h == self.H and w == self.W
        z = x.reshape(c, h * w).astype(jnp.float32)
        z = jnp.pad(z, ((0, self.c_pad - c), (0, 0)))
        out = self.call(z, *self.params)
        return out[:c].reshape(1, c, h, w)


if __name__ == "__main__":
    H = W = 16
    batch_size = 5
    hidden_planes = 16
    model = Res2NetPallas(epsilon=0.2, hidden_planes=hidden_planes, batch_size=batch_size,
                          H=H, W=W, seed=0)

    key = jax.random.PRNGKey(0)
    x = jax.random.normal(key, (1, 3 * batch_size, H, W), dtype=jnp.float32)

    out = jax.block_until_ready(model(x))
    assert out.shape == (1, 3 * batch_size, H, W)
    assert bool(jnp.all(jnp.isfinite(out)))

    # numerical check of the fused kernel against a pure-JAX reference of the torch module
    ref = jax.block_until_ready(
        res2net_reference(x, model.raws, model.block_kd,
                          hidden=hidden_planes, scale=model.scale,
                          batch=batch_size, eps=model.epsilon))
    max_err = float(jnp.max(jnp.abs(out - ref)))
    assert max_err < 3e-2, f"kernel/reference mismatch: max abs err = {max_err}"

    print("KERNEL_OK")
</pallas_src>

<mosaic_0001>
module attributes {stable_mosaic.version = 11 : i64} {
  func.func @probe(%arg0: memref<8x128xf32, #tpu.memory_space<vmem>>, %arg1: memref<8x128xf32, #tpu.memory_space<vmem>>) attributes {dimension_semantics = [], scalar_prefetch = 0 : i64, scratch_operands = 0 : i64, tpu.core_type = #tpu.core_type<tc>} {
    %c0 = arith.constant 0 : index
    %c0_0 = arith.constant 0 : index
    %0 = vector.load %arg0[%c0, %c0_0] : memref<8x128xf32, #tpu.memory_space<vmem>>, vector<8x128xf32>
    %c1_i32 = arith.constant 1 : i32
    %1 = tpu.dynamic_rotate %0 by %c1_i32 dim 1 : vector<8x128xf32>, i32 -> vector<8x128xf32>
    %c0_1 = arith.constant 0 : index
    %c0_2 = arith.constant 0 : index
    %2 = vector.load %arg1[%c0_1, %c0_2] : memref<8x128xf32, #tpu.memory_space<vmem>>, vector<8x128xf32>
    tpu.vector_store %arg1[%c0_1, %c0_2], %1 {strides = array<i32>} : memref<8x128xf32, #tpu.memory_space<vmem>>, vector<8x128xf32>,
    return
  }
}

</mosaic_0001>

<bundles_post_ra>
// kernel: tpu_custom_call.1
= control target key start
LH: loop header
LB: loop body
LE: loop exit
PB: predicated region body
PF: predicated region fallthrough
CT: control target
= control target key end

     0   :  { %6 = vsyncpa [#allocation3], 0  ;;  %s106_s0 = inlined_call_operand.hbm [shape: f32[8,128], index: 0, kind: input, shape index: {}]   ;;  %s107_s1 = inlined_call_operand.hbm [shape: f32[8,128], index: 1, kind: output, shape index: {}]  }
   0x1   :  { %7 = vsyncpa [#allocation4], 0  ;;  %s87_s6 = smov [#allocation2]  }
   0x2   :  { %s14_s7 = sshll.u32 %s87_s6, 4  ;;  %s15_s7 = int_to_ptr.vmem [resolvable:$true] %s14_s7 }
   0x3   :  { %s51_s8 = scalar_lea.vmem %s15_s7, 128  ;;  %p56_p1 = scmp.lt.s32.totalorder %s15_s7, %s15_s7 }
   0x4   :  { %p52_p0 = scmp.ne.s32.totalorder %s15_s7, %s51_s8  ;;  %p57_p2 = scmp.lt.s32.totalorder %s51_s8, %s51_s8 }
   0x6   :  { %p58_p3 = por %p57_p2, %p56_p1 }
   0x8   :  { %p59_p4 = pnand %p58_p3, %p52_p0 }
   0xa   :  { %62 = shalt.err (!%p59_p4)
}
   0xb   :  { %17 = dma.hbm_to_vmem [thread:$0]  %s106_s0, 128, %s15_s7, [#allocation3]  }
   0xc   :  { %83 = dma.done.wait [#allocation3], 128  }
   0xd   :  { %84 = vsyncadd [#allocation3], 4294967168  ;;  %v21_v0 = vld [vmem:[#allocation2] sm:$0xff]  ;;  %s88_s11 = smov 1   ;;  %s89_s12 = smov [#allocation5]  }
   0xe   :  { %22 = vrot.lane.b32.xlu0 %v21_v0, %s88_s11  ;;  %s31_s13 = sshll.u32 %s89_s12, 4  ;;  %s32_s13 = int_to_ptr.vmem [resolvable:$true] %s31_s13 }
   0xf   :  { %s63_s14 = scalar_lea.vmem %s32_s13, 128  ;;  %p68_p6 = scmp.lt.s32.totalorder %s32_s13, %s32_s13 }
  0x10   :  { %p64_p5 = scmp.ne.s32.totalorder %s32_s13, %s63_s14  ;;  %p69_p7 = scmp.lt.s32.totalorder %s63_s14, %s63_s14 }
  0x12   :  { %p70_p8 = por %p69_p7, %p68_p6 }
  0x14   :  { %p71_p9 = pnand %p70_p8, %p64_p5 }
  0x80   :  { %v23_v1 = vpop.permute.xlu0 %22 }
  0x81   :  { %24 = vst [vmem:[#allocation5] sm:$0xff] %v23_v1 }
  0x82   :  { %74 = shalt.err (!%p71_p9)
}
  0x83   :  { %34 = dma.vmem_to_hbm [thread:$0]  %s32_s13, 128, %s107_s1, [#allocation4]  }
  0x84   :  { %85 = dma.done.wait [#allocation4], 128  }
  0x85   :  { %86 = vsyncadd [#allocation4], 4294967168 }
  0x86   :  { %38 = vsyncpa [#allocation3], 1 }
  0x87   :  { %39 = vsyncpa [#allocation4], 1 }

</bundles_post_ra>
